<compile_context>
chip_gen: v6e
topology: v6e:2x2x1
jax: 0.10.0
libtpu: 0.0.40
codegen_flags: <defaults>
</compile_context>

<pallas_src>
import jax
import jax.numpy as jnp
from jax import lax
from jax.experimental import pallas as pl
from jax.experimental.pallas import tpu as pltpu


def _score_kernel(num_ref, hid_ref, wnum_ref, wscore_ref, out_ref):
    # num_ref:    (1, TL, I)  streamed num_embeddings tile (native dtype)
    # hid_ref:    (1, H, 1)   f32 hidden @ W_hid.T + b_attn for this batch
    # wnum_ref:   (H, I)      W_attn[:, H:] in the streamed dtype (grid-invariant)
    # wscore_ref: (1, H)      f32 score weights (grid-invariant)
    # out_ref:    (1, 1, TL)  lane-dense score row
    num = num_ref[0]                                            # (TL, I)
    # energy^T: contract both operands over I (lane dim of each) so the MXU
    # produces a lane-dense (H, TL) tile directly (no XLU transpose of the big
    # streamed tile).  Accumulate in f32.
    energy = lax.dot_general(
        wnum_ref[...], num,
        dimension_numbers=(((1,), (1,)), ((), ())),
        preferred_element_type=jnp.float32)                     # (H, TL) f32
    energy = jnp.tanh(energy + hid_ref[0])                      # (H,1) lane-bcast
    # (1, H) @ (H, TL) -> (1, TL): canonical MXU matmul, lane-dense result.
    s = jnp.dot(wscore_ref[...], energy,
                preferred_element_type=jnp.float32)             # (1, TL)
    out_ref[0] = s.astype(out_ref.dtype)


def score_forward(hidden, num_embeddings, W_attn, b_attn, W_score, num_mask=None):
    """hidden: (B,1,H), num_embeddings: (B,L,I),
       W_attn: (H, H+I), b_attn: (H,), W_score: (1, H)  (PyTorch Linear layouts)."""
    B, L, I = num_embeddings.shape
    H = hidden.shape[-1]

    stream_dtype = num_embeddings.dtype
    out_dtype = jnp.result_type(hidden.dtype, num_embeddings.dtype)

    W_attn_f32 = jnp.asarray(W_attn, jnp.float32)
    b_attn_f32 = jnp.asarray(b_attn, jnp.float32)
    W_score_f32 = jnp.asarray(W_score, jnp.float32).reshape(1, H)

    # Hoist the per-batch hidden contribution (identical for every L position).
    # Tiny -> keep in f32 for accuracy.
    W_hid = W_attn_f32[:, :H]                                        # (H, H)
    hid_term = (jnp.asarray(hidden, jnp.float32).reshape(B, H) @ W_hid.T
                + b_attn_f32).reshape(B, H, 1)                       # (B, H, 1)
    # Weight slab for the streamed operand stays in the streamed dtype so the
    # dominant matmul runs on the native (bf16-friendly) MXU path.
    W_num = W_attn_f32[:, H:].astype(stream_dtype)                   # (H, I)

    # ---- L-tile choice: byte budget + explicit VMEM accounting ---------------
    itemsize = jnp.dtype(stream_dtype).itemsize
    # Per L row resident in VMEM: double-buffered num row, f32 (H, TL)
    # energy/tanh intermediates (~3x), double-buffered f32 output row.
    per_row = 2 * I * itemsize + 3 * H * 4 + 2 * 4
    vmem_budget = 20 * 1024 * 1024          # well under the 32 MiB scoped limit
    stream_target = 4 * 1024 * 1024         # ~4 MiB DMAs on the num stream
    rows_budget = max(1, vmem_budget // per_row)
    rows_stream = max(1, stream_target // max(I * itemsize, 1))
    max_rows = min(rows_budget, rows_stream)
    if L <= max_rows:
        TL = L                              # full-L tile (block dim == array dim)
    else:
        TL = max(128, (max_rows // 128) * 128)   # multiple of 128: lane-dense out
    nL = pl.cdiv(L, TL)
    # TODO(synk): for extremely large I the forced 128-row minimum tile can exceed
    # the VMEM budget; that regime would need an extra reduction tiling over I.

    out = pl.pallas_call(
        _score_kernel,
        out_shape=jax.ShapeDtypeStruct((B, 1, L), out_dtype),
        grid_spec=pltpu.PrefetchScalarGridSpec(
            num_scalar_prefetch=0,
            grid=(B, nL),
            in_specs=[
                pl.BlockSpec((1, TL, I), lambda b, l: (b, l, 0)),   # streamed num
                pl.BlockSpec((1, H, 1), lambda b, l: (b, 0, 0)),    # hid_term[b]
                pl.BlockSpec((H, I), lambda b, l: (0, 0)),          # W_num (resident)
                pl.BlockSpec((1, H), lambda b, l: (0, 0)),          # W_score (resident)
            ],
            out_specs=pl.BlockSpec((1, 1, TL), lambda b, l: (b, 0, l)),
        ),
        compiler_params=pltpu.CompilerParams(
            dimension_semantics=("parallel", "parallel"),
            # Accounting: 2*TL*I*itemsize + ~3*TL*H*4 + 2*TL*4 + 2*(H*I + 2*H)
            # <= 20 MiB by the TL clamp above.  32 MiB scoped limit leaves
            # headroom on every generation (v5e default is only 16 MiB; v7x has
            # 64 MiB physical per TC).
            vmem_limit_bytes=32 * 1024 * 1024),
    )(num_embeddings, hid_term, W_num, W_score_f32)

    score = out.reshape(B, L)
    # Mask fill is a trivially fused XLA op; keeping it out of the kernel drops a
    # lane-width-1 input stream.
    if num_mask is not None:
        score = jnp.where(num_mask, jnp.asarray(-1e12, score.dtype), score)
    return score


def _reference(hidden, num_embeddings, W_attn, b_attn, W_score, num_mask=None):
    B, L, I = num_embeddings.shape
    H = hidden.shape[-1]
    hid_rep = jnp.broadcast_to(hidden.astype(jnp.float32), (B, L, H))
    e_in = jnp.concatenate(
        [hid_rep, num_embeddings.astype(jnp.float32)], axis=2).reshape(-1, H + I)
    s = jnp.tanh(e_in @ W_attn.T + b_attn) @ W_score.T
    s = s.reshape(B, L)
    if num_mask is not None:
        s = jnp.where(num_mask, -1e12, s)
    return s


if __name__ == "__main__":
    key = jax.random.PRNGKey(0)
    B, L = 2, 8
    input_size, hidden_size = 32, 32
    D = input_size + hidden_size

    k1, k2, k3, k4, k5, k6 = jax.random.split(key, 6)
    # Deterministic synthetic parameters (PyTorch Linear shapes: (out, in)).
    W_attn = jax.random.normal(k1, (hidden_size, D), jnp.float32) * 0.1
    b_attn = jax.random.normal(k2, (hidden_size,), jnp.float32) * 0.1
    W_score = jax.random.normal(k3, (1, hidden_size), jnp.float32) * 0.1

    hidden = jax.random.normal(k4, (B, 1, hidden_size), jnp.float32)
    num_embeddings = jax.random.normal(k5, (B, L, input_size), jnp.float32)
    num_mask = jax.random.bernoulli(k6, 0.25, (B, L))

    out = score_forward(hidden, num_embeddings, W_attn, b_attn, W_score, num_mask)
    out = jax.block_until_ready(out)

    ref = _reference(hidden, num_embeddings, W_attn, b_attn, W_score, num_mask)
    assert out.shape == (B, L)
    assert jnp.allclose(out, ref, atol=5e-4, rtol=5e-4), "mismatch vs reference"

    print("KERNEL_OK")
</pallas_src>

<mosaic_0001>
module attributes {stable_mosaic.version = 11 : i64} {
  func.func @_score_kernel(%arg0: i32, %arg1: i32, %arg2: memref<1x8x32xf32, #tpu.memory_space<vmem>>, %arg3: memref<1x32x1xf32, #tpu.memory_space<vmem>>, %arg4: memref<32x32xf32, #tpu.memory_space<vmem>>, %arg5: memref<1x32xf32, #tpu.memory_space<vmem>>, %arg6: memref<1x1x8xf32, #tpu.memory_space<vmem>>) attributes {dimension_semantics = [#tpu.dimension_semantics<parallel>, #tpu.dimension_semantics<parallel>], iteration_bounds = array<i64: 2, 1>, scalar_prefetch = 0 : i64, scratch_operands = 0 : i64, tpu.core_type = #tpu.core_type<tc>, window_params = [{transform_indices = @transform_0, window_bounds = array<i64: 1, 8, 32>}, {transform_indices = @transform_1, window_bounds = array<i64: 1, 32, 1>}, {pipeline_mode = #tpu.pipeline_mode<synchronous>, transform_indices = @transform_2, window_bounds = array<i64: 32, 32>}, {pipeline_mode = #tpu.pipeline_mode<synchronous>, transform_indices = @transform_3, window_bounds = array<i64: 1, 32>}, {transform_indices = @transform_4, window_bounds = array<i64: 1, 1, 8>}]} {
    %c0 = arith.constant 0 : index
    %c0_0 = arith.constant 0 : index
    %c0_1 = arith.constant 0 : index
    %0 = vector.load %arg2[%c0, %c0_0, %c0_1] : memref<1x8x32xf32, #tpu.memory_space<vmem>>, vector<1x8x32xf32>
    %1 = vector.shape_cast %0 : vector<1x8x32xf32> to vector<8x32xf32>
    %c0_2 = arith.constant 0 : index
    %c0_3 = arith.constant 0 : index
    %2 = vector.load %arg4[%c0_2, %c0_3] : memref<32x32xf32, #tpu.memory_space<vmem>>, vector<32x32xf32>
    %cst = arith.constant dense<0.000000e+00> : vector<32x8xf32>
    %3 = tpu.matmul %2, %1, %cst {dimension_numbers = #tpu.dot_dimension_numbers<[1], [1], [0], [0], [0, 0, 1, 0], [], []>} : vector<32x32xf32>, vector<8x32xf32>, vector<32x8xf32> -> vector<32x8xf32>
    %c0_4 = arith.constant 0 : index
    %c0_5 = arith.constant 0 : index
    %c0_6 = arith.constant 0 : index
    %4 = vector.load %arg3[%c0_4, %c0_5, %c0_6] : memref<1x32x1xf32, #tpu.memory_space<vmem>>, vector<1x32x1xf32>
    %5 = vector.shape_cast %4 : vector<1x32x1xf32> to vector<32x1xf32>
    %6 = vector.broadcast %5 : vector<32x1xf32> to vector<32x8xf32>
    %7 = arith.addf %3, %6 : vector<32x8xf32>
    %8 = math.tanh %7 : vector<32x8xf32>
    %c0_7 = arith.constant 0 : index
    %c0_8 = arith.constant 0 : index
    %9 = vector.load %arg5[%c0_7, %c0_8] : memref<1x32xf32, #tpu.memory_space<vmem>>, vector<1x32xf32>
    %cst_9 = arith.constant dense<0.000000e+00> : vector<1x8xf32>
    %10 = tpu.matmul %9, %8, %cst_9 {dimension_numbers = #tpu.dot_dimension_numbers<[1], [0], [0], [1], [0, 0, 1, 1], [], []>} : vector<1x32xf32>, vector<32x8xf32>, vector<1x8xf32> -> vector<1x8xf32>
    %c0_10 = arith.constant 0 : index
    %c0_11 = arith.constant 0 : index
    %c0_12 = arith.constant 0 : index
    %11 = vector.load %arg6[%c0_10, %c0_11, %c0_12] : memref<1x1x8xf32, #tpu.memory_space<vmem>>, vector<1x1x8xf32>
    %12 = vector.shape_cast %11 : vector<1x1x8xf32> to vector<1x8xf32>
    %13 = vector.shape_cast %10 : vector<1x8xf32> to vector<1x1x8xf32>
    tpu.vector_store %arg6[%c0_10, %c0_11, %c0_12], %13 {strides = array<i32>} : memref<1x1x8xf32, #tpu.memory_space<vmem>>, vector<1x1x8xf32>,
    return
  }
  func.func @transform_0(%arg0: i32, %arg1: i32) -> (i32, i32, i32) {
    %c0_i32 = arith.constant 0 : i32
    %c0_i32_0 = arith.constant 0 : i32
    return %arg0, %arg1, %c0_i32 : i32, i32, i32
  }
  func.func @transform_1(%arg0: i32, %arg1: i32) -> (i32, i32, i32) {
    %c0_i32 = arith.constant 0 : i32
    %c0_i32_0 = arith.constant 0 : i32
    %c0_i32_1 = arith.constant 0 : i32
    return %arg0, %c0_i32, %c0_i32_0 : i32, i32, i32
  }
  func.func @transform_2(%arg0: i32, %arg1: i32) -> (i32, i32) {
    %c0_i32 = arith.constant 0 : i32
    %c0_i32_0 = arith.constant 0 : i32
    %c0_i32_1 = arith.constant 0 : i32
    return %c0_i32, %c0_i32_0 : i32, i32
  }
  func.func @transform_3(%arg0: i32, %arg1: i32) -> (i32, i32) {
    %c0_i32 = arith.constant 0 : i32
    %c0_i32_0 = arith.constant 0 : i32
    %c0_i32_1 = arith.constant 0 : i32
    return %c0_i32, %c0_i32_0 : i32, i32
  }
  func.func @transform_4(%arg0: i32, %arg1: i32) -> (i32, i32, i32) {
    %c0_i32 = arith.constant 0 : i32
    %c0_i32_0 = arith.constant 0 : i32
    return %arg0, %c0_i32, %arg1 : i32, i32, i32
  }
}

</mosaic_0001>

<bundles_post_ra>
// kernel: tpu_custom_call.1
= control target key start
LH: loop header
LB: loop body
LE: loop exit
PB: predicated region body
PF: predicated region fallthrough
CT: control target
= control target key end

     0   :  { %9 = vsyncpa [#allocation3], 0  ;;  %s898_s0 = inlined_call_operand.vmem [shape: f32[2,8,32], index: 0, kind: input, shape index: {}]   ;;  %s899_s1 = inlined_call_operand.vmem [shape: f32[2,32,1], index: 1, kind: input, shape index: {}]   ;;  %s900_s2 = inlined_call_operand.vmem [shape: f32[32,32], index: 2, kind: input, shape index: {}]   ;;  %s901_s3 = inlined_call_operand.vmem [shape: f32[1,32], index: 3, kind: input, shape index: {}]   ;;  %s902_s4 = inlined_call_operand.hbm [shape: f32[2,1,8], index: 4, kind: output, shape index: {}]  }
   0x1   :  { %11 = vsyncpa [#allocation3 + $0x1], 0  ;;  %s762_s15 = smov 0   ;;  %s764_s16 = smov 0  }
   0x2   :  { %s766_s17 = smov 0   ;;  %s768_s18 = smov 0  }
   0x3   :  { %s770_s19 = smov 0   ;;  %s772_s20 = smov 0  }
   0x4 LB: > { %s540_s21 = sadd.s32 4294967295, %s731_s20   ;;  %s541_s22 = sadd.s32 4294967294, %s731_s20   ;;  %s731_s20 = sphi %s772_s20, %s17_s20   ;;  %s727_s19 = sphi %s770_s19, %s909_s19   ;;  %s723_s18 = sphi %s768_s18, %s908_s18   ;;  %s719_s17 = sphi %s766_s17, %s907_s17   ;;  %s715_s16 = sphi %s764_s16, %s906_s16   ;;  %s711_s15 = sphi %s762_s15, %s905_s15  }
   0x5   : > { %s29_s23 = sadd.s32 1, %s727_s19  ;;  %s134_s24 = sadd.s32 1, %s719_s17 }
   0x6   : > { %p31_p0 = scmp.ge.s32.totalorder %s29_s23, 2  ;;  %p144_p1 = scmp.ne.s32.totalorder %s719_s17, %s715_s16 }
   0x7   : > { %p145_p2 = scmp.eq.s32.totalorder %s540_s21, 1  ;;  %p150_p3 = scmp.ne.s32.totalorder %s715_s16, %s711_s15 }
   0x8   : > { %s911_s23 = smov (%p31_p0, %s29_s23), 0  ;;  %p151_p5 = scmp.eq.s32.totalorder %s541_s22, 1 }
   0x9   : > { %p802_p4 = por %p145_p2, %p144_p1  ;;  %s129_s26 = ssub.s32 %s727_s19, %s911_s23 }
   0xa   : > { %p544_p6 = scmp.ge.s32.totalorder %s731_s20, 1  ;;  %p132_p7 = scmp.eq.s32.totalorder %s129_s26, 0 }
   0xb   : > { %p809_p8 = por %p151_p5, %p150_p3  ;;  %p193_p9 = scmp.lt.s32.totalorder %s731_s20, 3 }
   0xc   : > { %s815_s28 = scalar_select %p132_p7, %s719_s17, %s134_s24  }
   0xd   : > { %p194_p10 = pnand %p544_p6, %p193_p9 }
   0xe   : > { %p225_p11 = scmp.lt.s32.totalorder (!%p194_p10), %s723_s18, 1 }
   0xf   : > { %197 = sbr.rel (%p194_p10) target bundleno = 456 (0x1c8), region = 36 }
  0x14   : > { %vm266_vm0 = vcmask 261120   ;;  %v238_v0 = vld [vmem:[%s900_s2] sm:$0xff]  ;;  %v733_v1 = vmov 0   ;;  %s226_s5 = scalar_select %p225_p11, %s723_s18, 1  ;;  %v239_v5 = vld [vmem:[%s900_s2 + $0x8] sm:$0xff]  ;;  %v240_v7 = vld [vmem:[%s900_s2 + $0x10] sm:$0xff] }
  0x15   : > { %570 = vmatprep.mubr.msk.f32.mxu0 %vm266_vm0, %v238_v0  ;;  %646 = vset.pattern.permute.xlu1 %v733_v1  ;;  %v241_v9 = vld [vmem:[%s900_s2 + $0x18] sm:$0xff]  ;;  %v734_v10 = vmov 0.0   ;;  %vm735_vm1 = vmmov 0   ;;  %v371_v26 = vld [vmem:[%s901_s3] sm:$0x1]  ;;  %vm445_vm2 = vcmask 57344  }
  0x16   : > { %645 = vset.pattern.permute.xlu0 %v733_v1  ;;  %s545_s6 = sshll.u32 %s226_s5, 3  ;;  %s557_s7 = sshll.u32 %s226_s5, 5  ;;  %576 = vmatprep.subr.mxu1 %v734_v10 }
  0x17   : > { %s231_s10 = scalar_lea.vmem %s898_s0, %s545_s6  ;;  %s236_s13 = scalar_lea.vmem %s899_s1, %s557_s7  ;;  %584 = vmatprep.mubr.msk.f32.mxu1 %vm735_vm1, %v734_v10 }
  0x18   : > { %v237_v2 = vld [vmem:[%s231_s10] sm:$0xff]  ;;  %v245_v3 = vld [vmem:[%s236_s13 + $0x18] sm:$0xff]  ;;  %v243_v4 = vld [vmem:[%s236_s13 + $0x8] sm:$0xff]  ;;  %s223_s6 = sand.u32 1, %s715_s16   ;;  %s554_s7 = sshll.u32 %s723_s18, 4 }
  0x19   : > { %568 = vmatprep.subr.msk.mxu0 %vm266_vm0, %v237_v2  ;;  %263 = vperm.xlu0 %645, %v245_v3   ;;  %v244_v6 = vld [vmem:[%s236_s13 + $0x10] sm:$0xff]  ;;  %v242_v8 = vld [vmem:[%s236_s13] sm:$0xff]  ;;  %s224_s8 = scalar_lea.vmem [#allocation2], %s223_s6  ;;  %s852_s12 = scalar_lea.hbm %s902_s4, %s554_s7 }
  0x1a   : > { %569 = vmatpush3.xpose.msk.msra.mxu0 %vm266_vm0, %v237_v2  ;;  %253 = vperm.xlu1 %646, %v243_v4   ;;  %s461_s9 = sshll.u32 %s224_s8, 4  ;;  %s448_s13 = scalar_lea.sflag [#allocation3], %s223_s6  ;;  %s854_s9 = int_to_ptr.vmem [resolvable:$true] %s461_s9 }
  0x1b   : > { %s655_s14 = scalar_lea.vmem %s854_s9, 16  ;;  %s736_s18 = smov [#allocation2]  }
  0x1c   : > { %p656_p12 = scmp.ne.s32.totalorder %s854_s9, %s655_s14  ;;  %s659_s21 = sshll.u32 %s736_s18, 4  ;;  %s660_s21 = int_to_ptr.vmem [resolvable:$false] %s659_s21 }
  0x1d   : > { %571 = vmatmul.mubr.msk.f32.vlgmr.msra.gmra.mxu0 %vm266_vm0, %v239_v5  ;;  %258 = vperm.xlu0 %645, %v244_v6   ;;  %s661_s22 = scalar_lea.vmem %s660_s21, 32  ;;  %p662_p1 = scmp.lt.s32.totalorder %s854_s9, %s660_s21 }
  0x1e   : > { %573 = vmatprep.mubr.msk.f32.mxu0 %vm266_vm0, %v240_v7  ;;  %248 = vperm.xlu1 %646, %v242_v8   ;;  %p657_p13 = pnand %p656_p12, %p802_p4  ;;  %p663_p2 = scmp.lt.s32.totalorder %s661_s22, %s655_s14 }
  0x20   : > { %p658_p0 = pneg %p657_p13  ;;  %p664_p3 = por %p663_p2, %p662_p1 }
  0x21   : > { %574 = vmatmul.mubr.msk.f32.gmra.mxu0 %vm266_vm0, %v241_v9 }
  0x22   : > { %p665_p5 = pnand %p664_p3, %p658_p0 }
  0x94   : > { %v264_v11 = vpop.permute.xlu0 %263 }
  0x95   : > { %v254_v12 = vpop.permute.xlu1 %253 }
  0x98   : > { %v259_v16 = vpop.permute.xlu0 %258 }
  0x99   : > { %v249_v18 = vpop.permute.xlu1 %248 }
  0xdd   : > { %v572_v13 = vpop.f32.mrf.mxu0 }
  0xde   : > { %v354_v20 = vadd.f32 %v572_v13, %v254_v12 }
  0xdf   : > { %v348_v14 = vpop.f32.mrf.mxu0 }
  0xe0   : > { %v349_v22 = vadd.f32 %v348_v14, %v249_v18 }
  0xe1   : > { %v575_v15 = vpop.f32.mrf.mxu0 }
  0xe2   : > { %v364_v17 = vadd.f32 %v575_v15, %v264_v11 }
  0xe3   : > { %v358_v19 = vpop.f32.mrf.mxu0 }
  0xe4   : > { %647 = vtanh.f32 %v364_v17  ;;  %v359_v21 = vadd.f32 %v358_v19, %v259_v16 }
  0xe6   : > { %649 = vtanh.f32 %v359_v21 }
  0xe7   : > { %651 = vtanh.f32 %v354_v20 }
  0xe8   : > { %653 = vtanh.f32 %v349_v22 }
  0xf1   : > { %v648_v23 = vpop.eup %647 }
  0xf2   : > { %577 = vmatpush3.msra.mxu1 %v648_v23 }
  0xf3   : > { %v650_v24 = vpop.eup %649  ;;  %578 = vmatprep.subr.mxu1 %v734_v10 }
  0xf4   : > { %579 = vmatpush3.msra.mxu1 %v650_v24  ;;  %v652_v25 = vpop.eup %651 }
  0xf5   : > { %580 = vmatprep.subr.mxu1 %v734_v10  ;;  %v654_v27 = vpop.eup %653 }
  0xf6   : > { %581 = vmatpush3.msra.mxu1 %v652_v25 }
  0xf7   : > { %582 = vmatprep.subr.mxu1 %v734_v10 }
  0xf8   : > { %583 = vmatpush3.msra.mxu1 %v654_v27 }
  0xf9   : > { %585 = vmatmul.mubr.msk.f32.vlgmr.msra.gmra.mxu1 %vm266_vm0, %v371_v26 }
 0x1b9   : > { %v441_v28 = vpop.f32.mrf.mxu1 }
 0x1ba   : > { %446 = vst.msk [vmem:[%s224_s8] sm:$0x1] %vm445_vm2, %v441_v28 }
 0x1bb   : > { %v586_v29 = vpop.f32.mrf.mxu1 }
 0x1bc   : > { %668 = shalt.err (!%p665_p5)
}
 0x1bd   : > { %s669_s24 = scalar_lea.hbm %s852_s12, 16  ;;  %s673_s30 = scalar_lea.hbm %s902_s4, 32 }
 0x1be   : > { %p670_p6 = scmp.ne.s32.totalorder %s852_s12, %s669_s24  ;;  %p674_p10 = scmp.lt.s32.totalorder %s852_s12, %s902_s4 }
 0x1bf   : > { %p675_p11 = scmp.lt.s32.totalorder %s673_s30, %s669_s24 }
 0x1c0   : > { %p671_p7 = pnand %p670_p6, %p802_p4 }
 0x1c1   : > { %p676_p12 = por %p675_p11, %p674_p10 }
 0x1c2   : > { %p672_p9 = pneg %p671_p7 }
 0x1c4   : > { %p677_p13 = pnand %p676_p12, %p672_p9 }
 0x1c6   : > { %680 = shalt.err (!%p677_p13)
}
 0x1c7   : > { %587 = dma.vmem_to_hbm [thread:$0]  (%p802_p4), %s854_s9, 16, %s852_s12, %s448_s13  }
 0x1c8 PF: > { %p593_p0 = scmp.ge.s32.totalorder %s731_s20, 2  ;;  %s473_s7 = sand.u32 1, %s711_s15  }
 0x1c9   : > { %s474_s8 = scalar_lea.sflag [#allocation3], %s473_s7 }
 0x1ca   : > { %p590_p1 = pnand %p593_p0, %p809_p8 }
 0x1cc   : > { %p591_p2 = pneg %p590_p1 }
 0x1ce   : > { %706 = dma.done.wait (%p591_p2), %s474_s8, 16  }
 0x1cf   : > { %708 = vsyncadd (%p591_p2), %s474_s8, 4294967280  ;;  %s17_s20 = sadd.s32 1, %s731_s20   ;;  %s905_s15 = smov %s715_s16 }
 0x1d0   : > { %p14_p3 = scmp.ge.s32.totalorder %s17_s20, 4   ;;  %s906_s16 = smov %s719_s17 }
 0x1d1   : > { %s907_s17 = smov %s815_s28  ;;  %s908_s18 = smov %s727_s19 }
 0x1d2   : > { %s909_s19 = smov %s911_s23  ;;  %16 = sbr.rel (!%p14_p3) target bundleno = 4 (0x4), region = 74 }
 0x1d7   :  { %478 = vsyncpa [#allocation3], 1 }
 0x1d8   :  { %480 = vsyncpa [#allocation3 + $0x1], 1 }

</bundles_post_ra>
